<compile_context>
chip_gen: v5e
topology: v5e:2x2
jax: 0.10.0
libtpu: 0.0.40
codegen_flags: <defaults>
</compile_context>

<pallas_src>
import functools

import jax
import jax.numpy as jnp
from jax.experimental import pallas as pl
from jax.experimental.pallas import tpu as pltpu


# --------------------------- small shared helpers ---------------------------


def _vmem_capacity_bytes():
    """Physical per-core VMEM; conservative (v7x) fallback if unqueryable."""
    try:
        info = pltpu.get_tpu_info()
        cap = getattr(info, "vmem_capacity_bytes", None)
        if cap:
            return int(cap)
    except Exception:
        pass
    return 64 * 1024 * 1024


def _block_spec(shape, index_map, buffer_count=None):
    """BlockSpec with optional pipeline depth (graceful if unsupported)."""
    if buffer_count is not None:
        buffered = getattr(pl, "Buffered", None)
        if buffered is not None:
            try:
                return pl.BlockSpec(shape, index_map,
                                    pipeline_mode=buffered(buffer_count))
            except TypeError:
                pass
    return pl.BlockSpec(shape, index_map)


def _sublane_align(itemsize):
    # f32 -> 8, bf16/fp16 -> 16, int8/fp8 -> 32 (sublane packing of the dtype)
    return max(8, 32 // itemsize)


# --------------------------- fused single-pass path -------------------------


def _se_kernel(x_ref, w_ref, o_ref, *, inv_hw):
    # x_ref: (bblk*C, HW)        folded batch/channel block (input dtype)
    # w_ref: (bblk*C, bblk*C)    block-diagonal kron(I_bblk, W), already f32
    # o_ref: (bblk*C, HW)        output block
    x = x_ref[...]

    # AdaptiveAvgPool2d(1): f32 spatial sum divided by the true H*W.
    pooled = jnp.sum(x, axis=-1, keepdims=True, dtype=jnp.float32) * inv_hw

    # 1x1 conv (no bias) for every image of the block in one small matvec:
    #   scale_flat[b*C + o] = sum_i W[o, i] * pooled_flat[b*C + i]
    scale = jnp.dot(w_ref[...], pooled, preferred_element_type=jnp.float32)

    # x * se(x): broadcast over the lane (spatial) axis, in the input dtype.
    o_ref[...] = x * scale.astype(x.dtype)


def _pick_block_batches(B, C, HW, itemsize, sub_align,
                        max_block_bytes=4 * 1024 * 1024, max_bc=256):
    """Pick bblk (images per grid step) for the fused path.

    Valid:  block fits ~4 MiB, sublane dim aligned (or full extent), kron'd
            weight stays small.
    Prefer: grid with >= 2 steps (pipelining), even step count (v7x 2-TC
            sharding), then the largest block.
    Returns None when no valid config exists -> caller uses two-pass fallback.
    """
    best, best_key = None, None
    for bb in range(1, B + 1):
        if B % bb:
            continue
        bc = bb * C
        if bc * HW * itemsize > max_block_bytes:
            continue
        if not (bc % sub_align == 0 or bb == B):
            continue
        if bb > 1 and bc > max_bc:
            continue
        steps = B // bb
        key = (1 if steps >= 2 else 0,
               1 if (steps >= 2 and steps % 2 == 0) else 0,
               bb)
        if best_key is None or key > best_key:
            best, best_key = bb, key
    return best


def _se_fused(x2, wf, B, C, HW, bblk, vmem_cap):
    itemsize = jnp.dtype(x2.dtype).itemsize
    bc_blk = bblk * C
    steps = B // bblk
    block_bytes = bc_blk * HW * itemsize

    # Block-diagonal expansion so one (bc, bc) @ (bc, 1) matvec mixes channels
    # for every image of the block (no in-kernel reshapes). Pre-cast to f32
    # here so the kernel never re-casts constant data.
    w_big = jnp.kron(jnp.eye(bblk, dtype=jnp.float32), wf)
    w_bytes = int(w_big.size) * 4

    # Deeper input prefetch only where VMEM is plentiful (v5e/v6e 128 MiB).
    in_depth = 3 if (vmem_cap >= 96 * 1024 * 1024 and steps >= 4) else 2

    # Working set: in_depth x input block + 2 x output block + weight + slack.
    vmem_limit = (in_depth + 2) * block_bytes + 2 * w_bytes + (8 << 20)
    vmem_limit = max(vmem_limit, 32 << 20)
    vmem_limit = min(vmem_limit, (vmem_cap * 3) // 4)

    cost = pl.CostEstimate(
        flops=2 * B * C * HW + 2 * steps * bc_blk * bc_blk,
        transcendentals=0,
        bytes_accessed=2 * B * C * HW * itemsize + w_bytes,
    )

    x_spec = _block_spec((bc_blk, HW), lambda i: (i, 0),
                         buffer_count=in_depth if in_depth != 2 else None)
    w_spec = _block_spec((bc_blk, bc_blk), lambda i: (0, 0), buffer_count=1)
    o_spec = pl.BlockSpec((bc_blk, HW), lambda i: (i, 0))

    out2 = pl.pallas_call(
        functools.partial(_se_kernel, inv_hw=1.0 / HW),
        out_shape=jax.ShapeDtypeStruct((B * C, HW), x2.dtype),
        grid_spec=pltpu.PrefetchScalarGridSpec(
            num_scalar_prefetch=0,
            grid=(steps,),
            in_specs=[x_spec, w_spec],
            out_specs=o_spec,
        ),
        compiler_params=pltpu.CompilerParams(
            dimension_semantics=("parallel",),
            vmem_limit_bytes=int(vmem_limit),
        ),
        cost_estimate=cost,
    )(x2, w_big)
    return out2


# ------------------------- two-pass fallback path ---------------------------


def _scale_mul_kernel(x_ref, s_ref, o_ref):
    # x_ref: (r_blk, hw_blk), s_ref: (r_blk, 1) f32, o_ref: (r_blk, hw_blk)
    o_ref[...] = x_ref[...] * s_ref[...].astype(o_ref.dtype)


def _se_two_pass(x2, wf, B, C, HW, sub_align, vmem_cap):
    """For images whose (C, HW) slab exceeds the fused block budget.

    Pass 1: pooled mean + tiny C x C matvec (left to XLA; one HBM read of x).
    Pass 2: HW/row-tiled Pallas broadcast multiply (one read + one write).
    """
    # TODO(synk): replace the XLA pooling pass with a fused HW-tiled Pallas
    # reduction (accumulator over a second grid axis) to shave the extra read.
    itemsize = jnp.dtype(x2.dtype).itemsize
    BC = B * C

    pooled = jnp.mean(x2, axis=-1, dtype=jnp.float32).reshape(B, C)   # (B, C)
    scale = jnp.matmul(pooled, wf.T).reshape(BC, 1)                   # f32

    # Row tile: multiple of the sublane alignment (or the full extent);
    # lane tile: multiple of 128 (or the full extent). cdiv grids + masked
    # edge blocks handle ragged remainders for this purely elementwise pass.
    if BC <= sub_align:
        r_blk = BC
    else:
        r_blk = min(512, (BC // sub_align) * sub_align)

    target_bytes = 2 * 1024 * 1024
    if HW < 128:
        hw_blk = HW
    else:
        hw_cap = ((HW + 127) // 128) * 128
        hw_blk = ((target_bytes // (r_blk * itemsize)) // 128) * 128
        hw_blk = max(128, min(hw_blk, hw_cap))

    grid = (pl.cdiv(BC, r_blk), pl.cdiv(HW, hw_blk))
    block_bytes = r_blk * hw_blk * itemsize

    vmem_limit = 4 * block_bytes + (8 << 20)
    vmem_limit = max(vmem_limit, 32 << 20)
    vmem_limit = min(vmem_limit, (vmem_cap * 3) // 4)

    cost = pl.CostEstimate(
        flops=BC * HW,
        transcendentals=0,
        bytes_accessed=2 * BC * HW * itemsize + BC * 4,
    )

    out2 = pl.pallas_call(
        _scale_mul_kernel,
        out_shape=jax.ShapeDtypeStruct((BC, HW), x2.dtype),
        grid_spec=pltpu.PrefetchScalarGridSpec(
            num_scalar_prefetch=0,
            grid=grid,
            in_specs=[
                pl.BlockSpec((r_blk, hw_blk), lambda i, j: (i, j)),
                pl.BlockSpec((r_blk, 1), lambda i, j: (i, 0)),
            ],
            out_specs=pl.BlockSpec((r_blk, hw_blk), lambda i, j: (i, j)),
        ),
        compiler_params=pltpu.CompilerParams(
            dimension_semantics=("parallel", "parallel"),
            vmem_limit_bytes=int(vmem_limit),
        ),
        cost_estimate=cost,
    )(x2, scale)
    return out2


# --------------------------------- wrapper ----------------------------------


def simple_se_module(x, weight):
    """x: (B, C, H, W) NCHW; weight: Conv2d weight (C, C, 1, 1) or (C, C)."""
    B, C, H, W = x.shape
    HW = H * W
    itemsize = jnp.dtype(x.dtype).itemsize
    sub_align = _sublane_align(itemsize)

    wf = jnp.asarray(weight).reshape(weight.shape[0], weight.shape[1])
    wf = wf.astype(jnp.float32)                                    # (C, C)

    # Free (contiguous) fold; no pad, no crop, no extra HBM passes.
    x2 = x.reshape(B * C, HW)

    vmem_cap = _vmem_capacity_bytes()
    bblk = _pick_block_batches(B, C, HW, itemsize, sub_align)

    if bblk is None:
        out2 = _se_two_pass(x2, wf, B, C, HW, sub_align, vmem_cap)
    else:
        out2 = _se_fused(x2, wf, B, C, HW, bblk, vmem_cap)

    return out2.reshape(B, C, H, W)


# ----------------------------------- test -----------------------------------


if __name__ == "__main__":
    key = jax.random.PRNGKey(0)
    k1, k2, k3, k4, k5, k6 = jax.random.split(key, 6)

    def _ref(x, weight):
        c = x.shape[1]
        wmat = jnp.asarray(weight).reshape(c, c)
        pooled = jnp.mean(x, axis=(2, 3))                   # (B, C)
        scale = jnp.einsum("oc,bc->bo", wmat, pooled)       # (B, C)
        return x * scale[:, :, None, None]

    # 1) Module-spec shape (B=2, C=4, 16x16), conv-style (C, C, 1, 1) weight.
    x1 = jax.random.normal(k1, (2, 4, 16, 16), dtype=jnp.float32)
    w1 = jax.random.normal(k2, (4, 4, 1, 1), dtype=jnp.float32) * 0.1
    y1 = jax.block_until_ready(simple_se_module(x1, w1))
    assert jnp.allclose(y1, _ref(x1, w1), atol=1e-5, rtol=1e-5)

    # 2) Multi-step grid (software pipelining / v7x megacore sharding path),
    #    non-multiple-of-128 spatial extent (masked-edge stores).
    x2_ = jax.random.normal(k3, (4, 8, 8, 8), dtype=jnp.float32)
    w2_ = jax.random.normal(k4, (8, 8), dtype=jnp.float32) * 0.1
    y2 = jax.block_until_ready(simple_se_module(x2_, w2_))
    assert jnp.allclose(y2, _ref(x2_, w2_), atol=1e-5, rtol=1e-5)

    # 3) Two-pass fallback (single image exceeds the fused VMEM block budget).
    x3 = jax.random.normal(k5, (1, 112, 100, 100), dtype=jnp.float32)
    w3 = jax.random.normal(k6, (112, 112), dtype=jnp.float32) * 0.05
    y3 = jax.block_until_ready(simple_se_module(x3, w3))
    assert jnp.allclose(y3, _ref(x3, w3), atol=1e-5, rtol=1e-5)

    print("KERNEL_OK")
</pallas_src>

<mosaic_0001>
module attributes {stable_mosaic.version = 11 : i64} {
  func.func @_se_kernel(%arg0: i32, %arg1: memref<8x256xf32, #tpu.memory_space<vmem>>, %arg2: memref<8x8xf32, #tpu.memory_space<vmem>>, %arg3: memref<8x256xf32, #tpu.memory_space<vmem>>) attributes {dimension_semantics = [#tpu.dimension_semantics<parallel>], iteration_bounds = array<i64: 1>, scalar_prefetch = 0 : i64, scratch_operands = 0 : i64, tpu.core_type = #tpu.core_type<tc>, window_params = [{transform_indices = @transform_0, window_bounds = array<i64: 8, 256>}, {pipeline_mode = #tpu.pipeline_mode<synchronous>, transform_indices = @transform_1, window_bounds = array<i64: 8, 8>}, {transform_indices = @transform_2, window_bounds = array<i64: 8, 256>}]} {
    %c0 = arith.constant 0 : index
    %c0_0 = arith.constant 0 : index
    %0 = vector.load %arg1[%c0, %c0_0] : memref<8x256xf32, #tpu.memory_space<vmem>>, vector<8x256xf32>
    %cst = arith.constant dense<0.000000e+00> : vector<8xf32>
    %1 = vector.multi_reduction <add>, %0, %cst [1] : vector<8x256xf32> to vector<8xf32>
    %2 = vector.shape_cast %1 : vector<8xf32> to vector<8x1xf32>
    %cst_1 = arith.constant 3.906250e-03 : f32
    %3 = vector.broadcast %cst_1 : f32 to vector<8x1xf32>
    %4 = arith.mulf %2, %3 : vector<8x1xf32>
    %c0_2 = arith.constant 0 : index
    %c0_3 = arith.constant 0 : index
    %5 = vector.load %arg2[%c0_2, %c0_3] : memref<8x8xf32, #tpu.memory_space<vmem>>, vector<8x8xf32>
    %cst_4 = arith.constant dense<0.000000e+00> : vector<8x1xf32>
    %6 = tpu.matmul %5, %4, %cst_4 {dimension_numbers = #tpu.dot_dimension_numbers<[1], [0], [0], [1], [0, 0, 1, 1], [], []>} : vector<8x8xf32>, vector<8x1xf32>, vector<8x1xf32> -> vector<8x1xf32>
    %7 = vector.broadcast %6 : vector<8x1xf32> to vector<8x256xf32>
    %8 = arith.mulf %0, %7 : vector<8x256xf32>
    %c0_5 = arith.constant 0 : index
    %c0_6 = arith.constant 0 : index
    %9 = vector.load %arg3[%c0_5, %c0_6] : memref<8x256xf32, #tpu.memory_space<vmem>>, vector<8x256xf32>
    tpu.vector_store %arg3[%c0_5, %c0_6], %8 {strides = array<i32>} : memref<8x256xf32, #tpu.memory_space<vmem>>, vector<8x256xf32>,
    return
  }
  func.func @transform_0(%arg0: i32) -> (i32, i32) {
    %c0_i32 = arith.constant 0 : i32
    %c0_i32_0 = arith.constant 0 : i32
    return %arg0, %c0_i32 : i32, i32
  }
  func.func @transform_1(%arg0: i32) -> (i32, i32) {
    %c0_i32 = arith.constant 0 : i32
    %c0_i32_0 = arith.constant 0 : i32
    %c0_i32_1 = arith.constant 0 : i32
    return %c0_i32, %c0_i32_0 : i32, i32
  }
  func.func @transform_2(%arg0: i32) -> (i32, i32) {
    %c0_i32 = arith.constant 0 : i32
    %c0_i32_0 = arith.constant 0 : i32
    return %arg0, %c0_i32 : i32, i32
  }
}

</mosaic_0001>

<bundles_post_ra>
// kernel: tpu_custom_call.1
= control target key start
LH: loop header
LB: loop body
LE: loop exit
PB: predicated region body
PF: predicated region fallthrough
CT: control target
= control target key end

     0   :  { %7 = vsyncpa [#allocation3], 0  ;;  %s210_s0 = inlined_call_operand.hbm [shape: f32[8,256], index: 0, kind: input, shape index: {}]   ;;  %s211_s1 = inlined_call_operand.hbm [shape: f32[8,8], index: 1, kind: input, shape index: {}]   ;;  %s212_s2 = inlined_call_operand.hbm [shape: f32[8,256], index: 2, kind: output, shape index: {}]  }
   0x1   :  { %8 = vsyncpa [#allocation6], 0 }
   0x2   :  { %9 = vsyncpa [#allocation4], 0  ;;  %s15_s11 = sshll.u32 %s210_s0, 4  ;;  %s182_s12 = smov [#allocation2]   ;;  %s16_s11 = int_to_ptr.hbm [resolvable:$true] %s15_s11 }
   0x3   :  { %s17_s13 = sshll.u32 %s182_s12, 4  ;;  %s26_s16 = sshll.u32 %s211_s1, 4  ;;  %s18_s13 = int_to_ptr.vmem [resolvable:$true] %s17_s13  ;;  %s27_s16 = int_to_ptr.hbm [resolvable:$true] %s26_s16 }
   0x4   :  { %20 = dma.hbm_to_vmem [thread:$0]  %s16_s11, 256, %s18_s13, [#allocation3]  }
   0x5   :  { %s183_s17 = smov [#allocation5]  }
   0x6   :  { %s28_s18 = sshll.u32 %s183_s17, 4  ;;  %s29_s18 = int_to_ptr.vmem [resolvable:$true] %s28_s18 }
   0x7   :  { %31 = dma.hbm_to_vmem [thread:$0]  %s27_s16, 128, %s29_s18, [#allocation6]  }
   0x8   :  { %176 = dma.done.wait [#allocation3], 256  }
   0x9   :  { %177 = vsyncadd [#allocation3], 4294967040 }
   0xa   :  { %178 = dma.done.wait [#allocation6], 128  }
   0xb   :  { %179 = vsyncadd [#allocation6], 4294967168  ;;  %v40_v0 = vld [vmem:[#allocation2] sm:$0xff]  ;;  %v41_v1 = vld [vmem:[#allocation2 + $0x8] sm:$0xff]  ;;  %v184_v3 = vmov 0   ;;  %vm47_vm0 = vcmask 64512  }
   0xc   :  { %v42_v2 = vadd.f32 %v41_v1, %v40_v0  ;;  %103 = vset.pattern.permute.xlu0 %v184_v3  ;;  %v46_v6 = vld [vmem:[#allocation5] sm:$0xff]  ;;  %s185_s0 = smov [#allocation7]   ;;  %s87_s21 = sshll.u32 %s212_s2, 4  ;;  %s88_s21 = int_to_ptr.hbm [resolvable:$true] %s87_s21 }
   0xd   :  { %s85_s1 = sshll.u32 %s185_s0, 4  ;;  %s86_s1 = int_to_ptr.vmem [resolvable:$true] %s85_s1 }
   0xe   :  { %43 = vadd.xlane.f32.xlu0 %v42_v2 }
  0x81   :  { %v44_v4 = vpop.xlane.xlu0 %43 }
  0x82   :  { %v45_v5 = vmul.f32 0.00390625, %v44_v4 }
  0x84   :  { %66 = vmatpush.msra.mxu0 %v45_v5 }
  0x85   :  { %98 = vmatmul.msk.f32.vlgmr.msra.gmra.mxu0 %vm47_vm0, %v46_v6 }
 0x102   :  { %v68_v7 = vpop.f32.mrf.mxu0 }
 0x103   :  { %73 = vperm.xlu0 %103, %v68_v7  }
 0x175   :  { %v74_v8 = vpop.permute.xlu0 %73 }
 0x176   :  { %v76_v9 = vmul.f32 %v74_v8, %v40_v0  ;;  %v77_v10 = vmul.f32 %v74_v8, %v41_v1 }
 0x178   :  { %78 = vst [vmem:[#allocation7] sm:$0xff] %v76_v9 }
 0x179   :  { %79 = vst [vmem:[#allocation7 + $0x8] sm:$0xff] %v77_v10 }
 0x17a   :  { %90 = dma.vmem_to_hbm [thread:$0]  %s86_s1, 256, %s88_s21, [#allocation4]  }
 0x17b   :  { %180 = dma.done.wait [#allocation4], 256  }
 0x17c   :  { %181 = vsyncadd [#allocation4], 4294967040 }
 0x17d   :  { %95 = vsyncpa [#allocation3], 1 }
 0x17e   :  { %96 = vsyncpa [#allocation6], 1 }
 0x17f   :  { %97 = vsyncpa [#allocation4], 1 }

</bundles_post_ra>
